<compile_context>
chip_gen: v7x
topology: tpu7x:2x2x1
jax: 0.10.0
libtpu: 0.0.40
codegen_flags: <defaults>
</compile_context>

<pallas_src>
import functools

import numpy as np
import jax
import jax.numpy as jnp
from jax.experimental import pallas as pl
from jax.experimental.pallas import tpu as pltpu


@functools.lru_cache(maxsize=None)
def _interp_matrix_np(in_size: int, out_size: int) -> np.ndarray:
    """(out_size, in_size) bilinear interpolation matrix, align_corners=True."""
    w = np.zeros((out_size, in_size), dtype=np.float32)
    if out_size == 1:
        src = np.zeros((1,), dtype=np.float64)
    else:
        src = np.arange(out_size, dtype=np.float64) * (
            (in_size - 1) / (out_size - 1)
        )
    i0 = np.clip(np.floor(src).astype(np.int64), 0, in_size - 1)
    i1 = np.minimum(i0 + 1, in_size - 1)
    frac = (src - i0).astype(np.float32)
    rows = np.arange(out_size)
    w[rows, i0] += 1.0 - frac
    w[rows, i1] += frac
    return w


def _upsample_kernel(x_ref, ww_t_ref, wh_ref, o_ref):
    # x_ref:    (bb, Hin, Win)   block of (N*C) input slices
    # ww_t_ref: (Win, Wout)      width interpolation matrix, transposed
    # wh_ref:   (Hout, Hin)      height interpolation matrix
    # o_ref:    (bb, Hout, Wout)
    bb, h_in, w_in = x_ref.shape
    h_out = wh_ref.shape[0]
    w_out = ww_t_ref.shape[1]

    # Step 1: width interpolation as ONE big MXU matmul, M = bb*Hin rows.
    x2d = x_ref[...].reshape(bb * h_in, w_in)
    t = jnp.dot(x2d, ww_t_ref[...], preferred_element_type=jnp.float32)

    # Step 2: height interpolation, batched over the bb slices.
    t3 = t.reshape(bb, h_in, w_out)
    wh_b = jnp.broadcast_to(wh_ref[...], (bb, h_out, h_in))
    out = jnp.einsum(
        "bip,bpj->bij", wh_b, t3, preferred_element_type=jnp.float32
    )
    o_ref[...] = out.astype(o_ref.dtype)


def upsample_bilinear_2x(x: jnp.ndarray) -> jnp.ndarray:
    """Bilinear upsample by 2 with align_corners=True. x: (N, C, H, W) f32."""
    n, c, h_in, w_in = x.shape
    h_out, w_out = 2 * h_in, 2 * w_in

    # Baked numpy constants (cached): ~2 KiB each, no runtime weight build.
    wh = jnp.asarray(_interp_matrix_np(h_in, h_out))          # (Hout, Hin)
    ww_t = jnp.asarray(_interp_matrix_np(w_in, w_out).T)      # (Win, Wout)

    nc = n * c
    x3 = x.reshape(nc, h_in, w_in)

    # Choose how many (H,W) slices to process per grid step.  Keep the
    # double-buffered footprint small on every generation (v7x VMEM is 64 MiB
    # physical / 32 MiB default scoped); prefer a divisor of nc so there are
    # no partial edge blocks and no padding copies.
    per_slice_bytes = (h_in * w_in + h_in * w_out + h_out * w_out) * 4
    budget_bytes = 6 * 1024 * 1024
    bb = max(1, min(nc, budget_bytes // max(per_slice_bytes, 1)))
    while nc % bb != 0:
        bb -= 1
    grid = (nc // bb,)

    out3 = pl.pallas_call(
        _upsample_kernel,
        out_shape=jax.ShapeDtypeStruct((nc, h_out, w_out), x.dtype),
        grid=grid,
        in_specs=[
            pl.BlockSpec((bb, h_in, w_in), lambda i: (i, 0, 0)),
            # Constant block index -> the tiny weights are DMA'd once and stay
            # resident across all grid steps.
            pl.BlockSpec((w_in, w_out), lambda i: (0, 0)),
            pl.BlockSpec((h_out, h_in), lambda i: (0, 0)),
        ],
        out_specs=pl.BlockSpec((bb, h_out, w_out), lambda i: (i, 0, 0)),
        compiler_params=pltpu.CompilerParams(
            dimension_semantics=("arbitrary",),
        ),
    )(x3, ww_t, wh)

    return out3.reshape(n, c, h_out, w_out)


if __name__ == "__main__":
    key = jax.random.PRNGKey(0)
    x = jax.random.normal(key, (2, 4, 16, 16), dtype=jnp.float32)

    out = jax.block_until_ready(upsample_bilinear_2x(x))

    # Reference: same separable align_corners=True bilinear in pure JAX.
    wh_ref = jnp.asarray(_interp_matrix_np(16, 32))
    ww_ref = jnp.asarray(_interp_matrix_np(16, 32))
    ref = jnp.einsum("op,ncpq,rq->ncor", wh_ref, x, ww_ref)

    assert out.shape == (2, 4, 32, 32)
    assert jnp.allclose(out, ref, atol=1e-4, rtol=1e-5), float(
        jnp.max(jnp.abs(out - ref))
    )

    print("KERNEL_OK")
</pallas_src>

<mosaic_0001>
module attributes {stable_mosaic.version = 11 : i64} {
  func.func @_upsample_kernel(%arg0: i32, %arg1: memref<8x16x16xf32, #tpu.memory_space<vmem>>, %arg2: memref<16x32xf32, #tpu.memory_space<vmem>>, %arg3: memref<32x16xf32, #tpu.memory_space<vmem>>, %arg4: memref<8x32x32xf32, #tpu.memory_space<vmem>>) attributes {dimension_semantics = [#tpu.dimension_semantics<arbitrary>], iteration_bounds = array<i64: 1>, scalar_prefetch = 0 : i64, scratch_operands = 0 : i64, tpu.core_type = #tpu.core_type<tc>, window_params = [{transform_indices = @transform_0, window_bounds = array<i64: 8, 16, 16>}, {pipeline_mode = #tpu.pipeline_mode<synchronous>, transform_indices = @transform_1, window_bounds = array<i64: 16, 32>}, {pipeline_mode = #tpu.pipeline_mode<synchronous>, transform_indices = @transform_2, window_bounds = array<i64: 32, 16>}, {transform_indices = @transform_3, window_bounds = array<i64: 8, 32, 32>}]} {
    %c0 = arith.constant 0 : index
    %c0_0 = arith.constant 0 : index
    %c0_1 = arith.constant 0 : index
    %0 = vector.load %arg1[%c0, %c0_0, %c0_1] : memref<8x16x16xf32, #tpu.memory_space<vmem>>, vector<8x16x16xf32>
    %1 = vector.shape_cast %0 : vector<8x16x16xf32> to vector<128x16xf32>
    %c0_2 = arith.constant 0 : index
    %c0_3 = arith.constant 0 : index
    %2 = vector.load %arg2[%c0_2, %c0_3] : memref<16x32xf32, #tpu.memory_space<vmem>>, vector<16x32xf32>
    %cst = arith.constant dense<0.000000e+00> : vector<128x32xf32>
    %3 = tpu.matmul %1, %2, %cst {dimension_numbers = #tpu.dot_dimension_numbers<[1], [0], [0], [1], [0, 0, 1, 1], [], []>} : vector<128x16xf32>, vector<16x32xf32>, vector<128x32xf32> -> vector<128x32xf32>
    %4 = vector.shape_cast %3 : vector<128x32xf32> to vector<8x16x32xf32>
    %c0_4 = arith.constant 0 : index
    %c0_5 = arith.constant 0 : index
    %5 = vector.load %arg3[%c0_4, %c0_5] : memref<32x16xf32, #tpu.memory_space<vmem>>, vector<32x16xf32>
    %6 = vector.shape_cast %5 : vector<32x16xf32> to vector<1x32x16xf32>
    %7 = vector.broadcast %6 : vector<1x32x16xf32> to vector<8x32x16xf32>
    "tpu.trace_start"() <{level = 10 : i32, message = "bip,bpj->bij"}> : () -> ()
    %cst_6 = arith.constant dense<0.000000e+00> : vector<8x32x32xf32>
    %8 = tpu.matmul %7, %4, %cst_6 {dimension_numbers = #tpu.dot_dimension_numbers<[2], [1], [1], [2], [0, 0, 0, 1, 1, 2], [0], [0]>} : vector<8x32x16xf32>, vector<8x16x32xf32>, vector<8x32x32xf32> -> vector<8x32x32xf32>
    "tpu.trace_stop"() : () -> ()
    %c0_7 = arith.constant 0 : index
    %c0_8 = arith.constant 0 : index
    %c0_9 = arith.constant 0 : index
    %9 = vector.load %arg4[%c0_7, %c0_8, %c0_9] : memref<8x32x32xf32, #tpu.memory_space<vmem>>, vector<8x32x32xf32>
    tpu.vector_store %arg4[%c0_7, %c0_8, %c0_9], %8 {strides = array<i32>} : memref<8x32x32xf32, #tpu.memory_space<vmem>>, vector<8x32x32xf32>,
    return
  }
  func.func @transform_0(%arg0: i32) -> (i32, i32, i32) {
    %c0_i32 = arith.constant 0 : i32
    %c0_i32_0 = arith.constant 0 : i32
    %c0_i32_1 = arith.constant 0 : i32
    return %arg0, %c0_i32, %c0_i32_0 : i32, i32, i32
  }
  func.func @transform_1(%arg0: i32) -> (i32, i32) {
    %c0_i32 = arith.constant 0 : i32
    %c0_i32_0 = arith.constant 0 : i32
    %c0_i32_1 = arith.constant 0 : i32
    return %c0_i32, %c0_i32_0 : i32, i32
  }
  func.func @transform_2(%arg0: i32) -> (i32, i32) {
    %c0_i32 = arith.constant 0 : i32
    %c0_i32_0 = arith.constant 0 : i32
    %c0_i32_1 = arith.constant 0 : i32
    return %c0_i32, %c0_i32_0 : i32, i32
  }
  func.func @transform_3(%arg0: i32) -> (i32, i32, i32) {
    %c0_i32 = arith.constant 0 : i32
    %c0_i32_0 = arith.constant 0 : i32
    %c0_i32_1 = arith.constant 0 : i32
    return %arg0, %c0_i32, %c0_i32_0 : i32, i32, i32
  }
}

</mosaic_0001>

<bundles_post_ra>
// kernel: tpu_custom_call.1
= control target key start
LH: loop header
LB: loop body
LE: loop exit
PB: predicated region body
PF: predicated region fallthrough
CT: control target
= control target key end

     0   :  { %8 = vsyncpa [#allocation3], 0  ;;  %s1469_s0 = inlined_call_operand.hbm [shape: f32[8,16,16], index: 0, kind: input, shape index: {}]   ;;  %s1470_s1 = inlined_call_operand.vmem [shape: f32[16,32], index: 1, kind: input, shape index: {}]   ;;  %s1471_s2 = inlined_call_operand.vmem [shape: f32[32,16], index: 2, kind: input, shape index: {}]   ;;  %s1472_s3 = inlined_call_operand.hbm [shape: f32[8,32,32], index: 3, kind: output, shape index: {}]  }
   0x1   :  { %9 = vsyncpa [#allocation4], 0  ;;  %s1297_s12 = smov [#allocation2]   ;;  %s1249_s16 = scalar_lea.hbm %s1469_s0, 2048 }
   0x2   :  { %s15_s13 = sshll.u32 %s1297_s12, 4  ;;  %p1250_p0 = scmp.ne.s32.totalorder %s1469_s0, %s1249_s16  ;;  %s16_s13 = int_to_ptr.vmem [resolvable:$true] %s15_s13 }
   0x3   :  { %p1253_p1 = scmp.lt.u32.totalorder %s1249_s16, %s1469_s0 }
   0x5   :  { %p1255_p2 = pnand %p1253_p1, %p1250_p0 }
   0x7   :  { %1258 = shalt.err (!%p1255_p2)
}
   0x8   :  { %s1259_s21 = scalar_lea.vmem %s16_s13, 2048  ;;  %p1264_p4 = scmp.lt.s32.totalorder %s16_s13, %s16_s13 }
   0x9   :  { %p1260_p3 = scmp.ne.s32.totalorder %s16_s13, %s1259_s21  ;;  %p1265_p5 = scmp.lt.s32.totalorder %s1259_s21, %s1259_s21 }
   0xb   :  { %p1266_p6 = por %p1265_p5, %p1264_p4 }
   0xd   :  { %p1267_p7 = pnand %p1266_p6, %p1260_p3 }
   0xf   :  { %1270 = shalt.err (!%p1267_p7)
}
  0x10   :  { %s1298_s22 = smov 128   ;;  %s1299_s23 = smov 8  }
  0x11   :  { %21 = dma.hbm_to_vmem [thread:$0]  %s1469_s0, 2048, %s16_s13, [#allocation3], %s1298_s22, %s1298_s22, %s1299_s23  }
  0x12   :  { %1293 = dma.done.wait [#allocation3], 2048  }
  0x13   :  { %1294 = vsyncadd [#allocation3], 4294965248  ;;  %vm47_vm0 = vcmask 130048   ;;  %v45_v0 = vld [vmem:[%s1470_s1] sm:$0xff]  ;;  %v46_v1 = vld [vmem:[%s1470_s1 + $0x8] sm:$0xff]  ;;  %vm937_vm1 = vcmask 261120  }
  0x14   :  { %v29_v2 = vld [vmem:[#allocation2] sm:$0xff]  ;;  %v1209_v3 = vpack.c.bf16 %v46_v1, %v45_v0  ;;  %v30_v4 = vld [vmem:[#allocation2 + $0x8] sm:$0xff]  ;;  %v31_v5 = vld [vmem:[#allocation2 + $0x10] sm:$0xff] }
  0x15   :  { %1105 = vmatprep.mubr.msk.f32.mxu0 %vm47_vm0, %v29_v2  ;;  %v32_v6 = vld [vmem:[#allocation2 + $0x18] sm:$0xff]  ;;  %v33_v7 = vld [vmem:[#allocation2 + $0x20] sm:$0xff]  ;;  %v34_v8 = vld [vmem:[#allocation2 + $0x28] sm:$0xff] }
  0x16   :  { %1210 = vmatprep.subr.bf16.mxu0 %v1209_v3  ;;  %v35_v9 = vld [vmem:[#allocation2 + $0x30] sm:$0xff]  ;;  %v36_v10 = vld [vmem:[#allocation2 + $0x38] sm:$0xff]  ;;  %v37_v11 = vld [vmem:[#allocation2 + $0x40] sm:$0xff] }
  0x17   :  { %1212 = vmatpush3.bf16.msra.mxu0 %v1209_v3  ;;  %v38_v12 = vld [vmem:[#allocation2 + $0x48] sm:$0xff]  ;;  %v39_v13 = vld [vmem:[#allocation2 + $0x50] sm:$0xff]  ;;  %v40_v14 = vld [vmem:[#allocation2 + $0x58] sm:$0xff] }
  0x18   :  { %v41_v15 = vld [vmem:[#allocation2 + $0x60] sm:$0xff]  ;;  %v42_v16 = vld [vmem:[#allocation2 + $0x68] sm:$0xff]  ;;  %v43_v17 = vld [vmem:[#allocation2 + $0x70] sm:$0xff] }
  0x19   :  { %v44_v18 = vld [vmem:[#allocation2 + $0x78] sm:$0xff]  ;;  %v1361_v19 = vld [vmem:[%s1471_s2] sm:$0xff]  ;;  %v1370_v25 = vld [vmem:[%s1471_s2 + $0x8] sm:$0xff] }
  0x1a   :  { %1106 = vmatmul.mubr.msk.f32.vlgmr.msra.gmra.mrb[0].mxu0 %vm47_vm0, %v30_v4  ;;  %1133 = vmatprep.mubr.msk.f32.mxu1 %vm47_vm0, %v1361_v19  ;;  %v243_v27 = vld [vmem:[%s1471_s2 + $0x10] sm:$0xff]  ;;  %v244_v30 = vld [vmem:[%s1471_s2 + $0x18] sm:$0xff]  ;;  %s1300_s2 = smov [#allocation5]  }
  0x1b   :  { %1108 = vmatprep.mubr.msk.f32.mxu0 %vm47_vm0, %v31_v5  ;;  %s975_s9 = sshll.u32 %s1300_s2, 4  ;;  %s976_s9 = int_to_ptr.vmem [resolvable:$true] %s975_s9 }
  0x1c   :  { %s1271_s10 = scalar_lea.vmem %s976_s9, 4096  ;;  %p1276_p9 = scmp.lt.s32.totalorder %s976_s9, %s976_s9 }
  0x1d   :  { %p1272_p8 = scmp.ne.s32.totalorder %s976_s9, %s1271_s10  ;;  %p1277_p10 = scmp.lt.s32.totalorder %s1271_s10, %s1271_s10 }
  0x1e   :  { %1109 = vmatmul.mubr.msk.f32.gmra.mrb[2].mxu0 %vm47_vm0, %v32_v6 }
  0x1f   :  { %1111 = vmatprep.mubr.msk.f32.mxu0 %vm47_vm0, %v33_v7  ;;  %p1278_p11 = por %p1277_p10, %p1276_p9 }
  0x21   :  { %p1279_p12 = pnand %p1278_p11, %p1272_p8 }
  0x22   :  { %1112 = vmatmul.mubr.msk.f32.gmra.mrb[4].mxu0 %vm47_vm0, %v34_v8 }
  0x23   :  { %1114 = vmatprep.mubr.msk.f32.mxu0 %vm47_vm0, %v35_v9 }
  0x26   :  { %1115 = vmatmul.mubr.msk.f32.gmra.mrb[6].mxu0 %vm47_vm0, %v36_v10 }
  0x27   :  { %1117 = vmatprep.mubr.msk.f32.mxu0 %vm47_vm0, %v37_v11 }
  0x2a   :  { %1118 = vmatmul.mubr.msk.f32.gmra.mrb[8].mxu0 %vm47_vm0, %v38_v12 }
  0x2b   :  { %1120 = vmatprep.mubr.msk.f32.mxu0 %vm47_vm0, %v39_v13 }
  0x2e   :  { %1121 = vmatmul.mubr.msk.f32.gmra.mrb[10].mxu0 %vm47_vm0, %v40_v14 }
  0x2f   :  { %1123 = vmatprep.mubr.msk.f32.mxu0 %vm47_vm0, %v41_v15 }
  0x32   :  { %1124 = vmatmul.mubr.msk.f32.gmra.mrb[12].mxu0 %vm47_vm0, %v42_v16 }
  0x33   :  { %1126 = vmatprep.mubr.msk.f32.mxu0 %vm47_vm0, %v43_v17 }
  0x36   :  { %1127 = vmatmul.mubr.msk.f32.gmra.mrb[14].mxu0 %vm47_vm0, %v44_v18 }
  0x37   :  { %1173 = vmatprep.mubr.msk.f32.mxu0 %vm47_vm0, %v1361_v19 }
  0xed   :  { %v1107_v20 = vpop.f32.mrb[0].mxu0 }
  0xee   :  { %v162_v21 = vpop.f32.mrb[1].mxu0 }
  0xef   :  { %v1213_v22 = vpack.c.bf16 %v1107_v20, %v162_v21 }
  0xf1   :  { %v1110_v23 = vpop.f32.mrb[2].mxu0  ;;  %1214 = vmatprep.subr.bf16.mxu1 %v1213_v22 }
  0xf2   :  { %v172_v24 = vpop.f32.mrb[3].mxu0  ;;  %1216 = vmatpush3.bf16.msra.mxu1 %v1213_v22 }
  0xf3   :  { %v1217_v26 = vpack.c.bf16 %v1110_v23, %v172_v24 }
  0xf5   :  { %v1113_v28 = vpop.f32.mrb[4].mxu0  ;;  %1134 = vmatmul.mubr.msk.f32.vlgmr.msra.gmra.mrb[0].mxu1 %vm47_vm0, %v1370_v25  ;;  %1218 = vmatprep.subr.bf16.mxu1 %v1217_v26 }
  0xf6   :  { %v182_v29 = vpop.f32.mrb[5].mxu0  ;;  %1220 = vmatpush3.bf16.msra.mxu1 %v1217_v26  ;;  %1136 = vmatprep.mubr.msk.f32.mxu1 %vm47_vm0, %v243_v27 }
  0xf7   :  { %v1221_v31 = vpack.c.bf16 %v1113_v28, %v182_v29 }
  0xf9   :  { %v1116_v32 = vpop.f32.mrb[6].mxu0  ;;  %1137 = vmatmul.mubr.msk.f32.gmra.mrb[2].mxu1 %vm47_vm0, %v244_v30  ;;  %1222 = vmatprep.subr.bf16.mxu1 %v1221_v31 }
  0xfa   :  { %v192_v33 = vpop.f32.mrb[7].mxu0  ;;  %1143 = vmatprep.mubr.msk.f32.mxu1 %vm47_vm0, %v1361_v19 }
  0xfb   :  { %v1225_v34 = vpack.c.bf16 %v1116_v32, %v192_v33 }
  0xfd   :  { %v1119_v35 = vpop.f32.mrb[8].mxu0  ;;  %1144 = vmatmul.mubr.msk.f32.vlgmr.msra.gmra.mrb[4].mxu1 %vm47_vm0, %v1370_v25 }
  0xfe   :  { %1224 = vmatpush3.bf16.msra.mxu1 %v1221_v31  ;;  %v202_v36 = vpop.f32.mrb[9].mxu0  ;;  %1146 = vmatprep.mubr.msk.f32.mxu1 %vm47_vm0, %v243_v27 }
  0xff   :  { %v1229_v37 = vpack.c.bf16 %v1119_v35, %v202_v36  ;;  %1226 = vmatprep.subr.bf16.mxu1 %v1225_v34 }
 0x101   :  { %1147 = vmatmul.mubr.msk.f32.gmra.mrb[6].mxu1 %vm47_vm0, %v244_v30  ;;  %1230 = vmatprep.subr.bf16.mxu0 %v1229_v37  ;;  %v1122_v38 = vpop.f32.mrb[10].mxu0 }
 0x102   :  { %1232 = vmatpush3.bf16.msra.mxu0 %v1229_v37  ;;  %1153 = vmatprep.mubr.msk.f32.mxu1 %vm47_vm0, %v1361_v19  ;;  %v212_v39 = vpop.f32.mrb[11].mxu0 }
 0x103   :  { %v1233_v40 = vpack.c.bf16 %v1122_v38, %v212_v39 }
 0x105   :  { %1154 = vmatmul.mubr.msk.f32.vlgmr.msra.gmra.mrb[8].mxu1 %vm47_vm0, %v1370_v25  ;;  %v1125_v41 = vpop.f32.mrb[12].mxu0  ;;  %1174 = vmatmul.mubr.msk.f32.vlgmr.msra.gmra.mrb[16].mxu0 %vm47_vm0, %v1370_v25 }
 0x106   :  { %1228 = vmatpush3.bf16.msra.mxu1 %v1225_v34  ;;  %1156 = vmatprep.mubr.msk.f32.mxu1 %vm47_vm0, %v243_v27  ;;  %v222_v42 = vpop.f32.mrb[13].mxu0 }
 0x107   :  { %1234 = vmatprep.subr.bf16.mxu1 %v1233_v40  ;;  %v1237_v43 = vpack.c.bf16 %v1125_v41, %v222_v42  ;;  %1176 = vmatprep.mubr.msk.f32.mxu0 %vm47_vm0, %v243_v27 }
 0x109   :  { %1157 = vmatmul.mubr.msk.f32.gmra.mrb[10].mxu1 %vm47_vm0, %v244_v30  ;;  %v1128_v44 = vpop.f32.mrb[14].mxu0  ;;  %1238 = vmatprep.subr.bf16.mxu0 %v1237_v43 }
 0x10a   :  { %1163 = vmatprep.mubr.msk.f32.mxu1 %vm47_vm0, %v1361_v19  ;;  %v232_v45 = vpop.f32.mrb[15].mxu0  ;;  %1240 = vmatpush3.bf16.msra.mxu0 %v1237_v43 }
 0x10b   :  { %v1241_v46 = vpack.c.bf16 %v1128_v44, %v232_v45  ;;  %1177 = vmatmul.mubr.msk.f32.gmra.mrb[18].mxu0 %vm47_vm0, %v244_v30 }
 0x10c   :  { %1193 = vmatprep.mubr.msk.f32.mxu0 %vm47_vm0, %v1361_v19 }
 0x10d   :  { %1164 = vmatmul.mubr.msk.f32.vlgmr.msra.gmra.mrb[12].mxu1 %vm47_vm0, %v1370_v25 }
 0x10e   :  { %1236 = vmatpush3.bf16.msra.mxu1 %v1233_v40  ;;  %1166 = vmatprep.mubr.msk.f32.mxu1 %vm47_vm0, %v243_v27 }
 0x10f   :  { %1242 = vmatprep.subr.bf16.mxu1 %v1241_v46  ;;  %1194 = vmatmul.mubr.msk.f32.vlgmr.msra.gmra.mrb[20].mxu0 %vm47_vm0, %v1370_v25 }
 0x110   :  { %1196 = vmatprep.mubr.msk.f32.mxu0 %vm47_vm0, %v243_v27 }
 0x111   :  { %1167 = vmatmul.mubr.msk.f32.gmra.mrb[14].mxu1 %vm47_vm0, %v244_v30 }
 0x112   :  { %1183 = vmatprep.mubr.msk.f32.mxu1 %vm47_vm0, %v1361_v19 }
 0x113   :  { %1197 = vmatmul.mubr.msk.f32.gmra.mrb[22].mxu0 %vm47_vm0, %v244_v30 }
 0x115   :  { %1184 = vmatmul.mubr.msk.f32.vlgmr.msra.gmra.mrb[16].mxu1 %vm47_vm0, %v1370_v25 }
 0x116   :  { %1244 = vmatpush3.bf16.msra.mxu1 %v1241_v46  ;;  %1186 = vmatprep.mubr.msk.f32.mxu1 %vm47_vm0, %v243_v27 }
 0x119   :  { %1187 = vmatmul.mubr.msk.f32.gmra.mrb[18].mxu1 %vm47_vm0, %v244_v30 }
 0x11a   :  { %1203 = vmatprep.mubr.msk.f32.mxu1 %vm47_vm0, %v1361_v19 }
 0x11d   :  { %1204 = vmatmul.mubr.msk.f32.vlgmr.msra.gmra.mrb[20].mxu1 %vm47_vm0, %v1370_v25 }
 0x11e   :  { %1206 = vmatprep.mubr.msk.f32.mxu1 %vm47_vm0, %v243_v27 }
 0x121   :  { %1207 = vmatmul.mubr.msk.f32.gmra.mrb[22].mxu1 %vm47_vm0, %v244_v30 }
 0x1c8   :  { %v1135_v47 = vpop.f32.mrb[0].mxu1 }
 0x1c9   :  { %939 = vst.msk [vmem:[#allocation5 + $0x8] sm:$0xff] %vm937_vm1, %v1135_v47  ;;  %v323_v48 = vpop.f32.mrb[1].mxu1 }
 0x1ca   :  { %938 = vst.msk [vmem:[#allocation5] sm:$0xff] %vm937_vm1, %v323_v48 }
 0x1cc   :  { %v1138_v49 = vpop.f32.mrb[2].mxu1 }
 0x1cd   :  { %941 = vst.msk [vmem:[#allocation5 + $0x18] sm:$0xff] %vm937_vm1, %v1138_v49  ;;  %v333_v50 = vpop.f32.mrb[3].mxu1 }
 0x1ce   :  { %940 = vst.msk [vmem:[#allocation5 + $0x10] sm:$0xff] %vm937_vm1, %v333_v50 }
 0x1d0   :  { %v1145_v51 = vpop.f32.mrb[4].mxu1 }
 0x1d1   :  { %943 = vst.msk [vmem:[#allocation5 + $0x28] sm:$0xff] %vm937_vm1, %v1145_v51  ;;  %v408_v52 = vpop.f32.mrb[5].mxu1 }
 0x1d2   :  { %942 = vst.msk [vmem:[#allocation5 + $0x20] sm:$0xff] %vm937_vm1, %v408_v52 }
 0x1d4   :  { %v1148_v53 = vpop.f32.mrb[6].mxu1 }
 0x1d5   :  { %945 = vst.msk [vmem:[#allocation5 + $0x38] sm:$0xff] %vm937_vm1, %v1148_v53  ;;  %v418_v54 = vpop.f32.mrb[7].mxu1 }
 0x1d6   :  { %944 = vst.msk [vmem:[#allocation5 + $0x30] sm:$0xff] %vm937_vm1, %v418_v54 }
 0x1d8   :  { %v1155_v55 = vpop.f32.mrb[8].mxu1  ;;  %v1175_v56 = vpop.f32.mrb[16].mxu0 }
 0x1d9   :  { %947 = vst.msk [vmem:[#allocation5 + $0x48] sm:$0xff] %vm937_vm1, %v1155_v55  ;;  %v493_v57 = vpop.f32.mrb[9].mxu1  ;;  %955 = vst.msk [vmem:[#allocation5 + $0x88] sm:$0xff] %vm937_vm1, %v1175_v56  ;;  %v663_v58 = vpop.f32.mrb[17].mxu0 }
 0x1da   :  { %946 = vst.msk [vmem:[#allocation5 + $0x40] sm:$0xff] %vm937_vm1, %v493_v57  ;;  %954 = vst.msk [vmem:[#allocation5 + $0x80] sm:$0xff] %vm937_vm1, %v663_v58 }
 0x1dc   :  { %v1158_v59 = vpop.f32.mrb[10].mxu1 }
 0x1dd   :  { %949 = vst.msk [vmem:[#allocation5 + $0x58] sm:$0xff] %vm937_vm1, %v1158_v59  ;;  %v503_v60 = vpop.f32.mrb[11].mxu1 }
 0x1de   :  { %948 = vst.msk [vmem:[#allocation5 + $0x50] sm:$0xff] %vm937_vm1, %v503_v60  ;;  %v1178_v61 = vpop.f32.mrb[18].mxu0 }
 0x1df   :  { %957 = vst.msk [vmem:[#allocation5 + $0x98] sm:$0xff] %vm937_vm1, %v1178_v61  ;;  %v673_v62 = vpop.f32.mrb[19].mxu0 }
 0x1e0   :  { %v1165_v63 = vpop.f32.mrb[12].mxu1  ;;  %956 = vst.msk [vmem:[#allocation5 + $0x90] sm:$0xff] %vm937_vm1, %v673_v62 }
 0x1e1   :  { %951 = vst.msk [vmem:[#allocation5 + $0x68] sm:$0xff] %vm937_vm1, %v1165_v63  ;;  %v578_v0 = vpop.f32.mrb[13].mxu1 }
 0x1e2   :  { %950 = vst.msk [vmem:[#allocation5 + $0x60] sm:$0xff] %vm937_vm1, %v578_v0  ;;  %v1195_v1 = vpop.f32.mrb[20].mxu0 }
 0x1e3   :  { %963 = vst.msk [vmem:[#allocation5 + $0xc8] sm:$0xff] %vm937_vm1, %v1195_v1  ;;  %v833_v2 = vpop.f32.mrb[21].mxu0 }
 0x1e4   :  { %v1168_v3 = vpop.f32.mrb[14].mxu1  ;;  %962 = vst.msk [vmem:[#allocation5 + $0xc0] sm:$0xff] %vm937_vm1, %v833_v2 }
 0x1e5   :  { %953 = vst.msk [vmem:[#allocation5 + $0x78] sm:$0xff] %vm937_vm1, %v1168_v3  ;;  %v588_v4 = vpop.f32.mrb[15].mxu1 }
 0x1e6   :  { %952 = vst.msk [vmem:[#allocation5 + $0x70] sm:$0xff] %vm937_vm1, %v588_v4  ;;  %v1198_v5 = vpop.f32.mrb[22].mxu0 }
 0x1e7   :  { %965 = vst.msk [vmem:[#allocation5 + $0xd8] sm:$0xff] %vm937_vm1, %v1198_v5  ;;  %v843_v6 = vpop.f32.mrb[23].mxu0 }
 0x1e8   :  { %v1185_v7 = vpop.f32.mrb[16].mxu1  ;;  %964 = vst.msk [vmem:[#allocation5 + $0xd0] sm:$0xff] %vm937_vm1, %v843_v6 }
 0x1e9   :  { %959 = vst.msk [vmem:[#allocation5 + $0xa8] sm:$0xff] %vm937_vm1, %v1185_v7  ;;  %v748_v8 = vpop.f32.mrb[17].mxu1 }
 0x1ea   :  { %958 = vst.msk [vmem:[#allocation5 + $0xa0] sm:$0xff] %vm937_vm1, %v748_v8 }
 0x1ec   :  { %v1188_v9 = vpop.f32.mrb[18].mxu1 }
 0x1ed   :  { %961 = vst.msk [vmem:[#allocation5 + $0xb8] sm:$0xff] %vm937_vm1, %v1188_v9  ;;  %v758_v10 = vpop.f32.mrb[19].mxu1 }
 0x1ee   :  { %960 = vst.msk [vmem:[#allocation5 + $0xb0] sm:$0xff] %vm937_vm1, %v758_v10 }
 0x1f0   :  { %v1205_v11 = vpop.f32.mrb[20].mxu1 }
 0x1f1   :  { %967 = vst.msk [vmem:[#allocation5 + $0xe8] sm:$0xff] %vm937_vm1, %v1205_v11  ;;  %v918_v12 = vpop.f32.mrb[21].mxu1 }
 0x1f2   :  { %966 = vst.msk [vmem:[#allocation5 + $0xe0] sm:$0xff] %vm937_vm1, %v918_v12 }
 0x1f4   :  { %v1208_v13 = vpop.f32.mrb[22].mxu1 }
 0x1f5   :  { %969 = vst.msk [vmem:[#allocation5 + $0xf8] sm:$0xff] %vm937_vm1, %v1208_v13  ;;  %v928_v14 = vpop.f32.mrb[23].mxu1 }
 0x1f6   :  { %968 = vst.msk [vmem:[#allocation5 + $0xf0] sm:$0xff] %vm937_vm1, %v928_v14 }
 0x1f7   :  { %1282 = shalt.err (!%p1279_p12)
}
 0x1f8   :  { %s1283_s13 = scalar_lea.hbm %s1472_s3, 4096 }
 0x1f9   :  { %p1284_p13 = scmp.ne.s32.totalorder %s1472_s3, %s1283_s13  ;;  %p1287_p0 = scmp.lt.u32.totalorder %s1283_s13, %s1472_s3 }
 0x1fb   :  { %p1289_p1 = pnand %p1287_p0, %p1284_p13 }
 0x1fd   :  { %1292 = shalt.err (!%p1289_p1)
}
 0x1fe   :  { %981 = dma.vmem_to_hbm [thread:$0]  %s976_s9, 4096, %s1472_s3, [#allocation4], %s1298_s22, %s1298_s22, %s1299_s23  }
 0x1ff   :  { %1295 = dma.done.wait [#allocation4], 4096  }
 0x200   :  { %1296 = vsyncadd [#allocation4], 4294963200 }
 0x201   :  { %985 = vsyncpa [#allocation3], 1 }
 0x202   :  { %986 = vsyncpa [#allocation4], 1 }

</bundles_post_ra>
